<compile_context>
chip_gen: v7x
topology: tpu7x:2x2x1
jax: 0.10.0
libtpu: 0.0.40
codegen_flags: <defaults>
</compile_context>

<pallas_src>
import functools
import math

import jax
import jax.numpy as jnp
from jax.experimental import pallas as pl
from jax.experimental.pallas import tpu as pltpu


VMEM_BUDGET_BYTES = 40 * 1024 * 1024   # block budget (portable incl. v7x 64 MiB VMEM)
VMEM_LIMIT_BYTES = 48 * 1024 * 1024    # scoped limit handed to Mosaic


# ----------------------------------------------------------------------------
# Fused kernel: bias head (fc1 -> ReLU -> fc2) + ArcMarginProduct
# ----------------------------------------------------------------------------
def _bias_loss_kernel(xa_ref, xb_ref, wn_ref, label_ref, w1_ref, b1_ref,
                      w2_ref, b2_ref, bias_out_ref, arc_out_ref, xn_ref, *,
                      tile_c, cos_m, sin_m, th, mm, s):
    j = pl.program_id(1)                       # class-tile index (innermost)
    contract_last = (((1,), (1,)), ((), ()))   # (m,k) x (n,k) -> (m,n), no transpose

    @pl.when(j == 0)
    def _():
        # --- L2-normalize x_arcface in f32 once per batch tile, cache as bf16 ---
        x_arc = xa_ref[...]                                      # [TB, Darc] f32
        nrm = jnp.sqrt(jnp.sum(x_arc * x_arc, axis=-1, keepdims=True))
        xn_ref[...] = (x_arc / jnp.maximum(nrm, 1e-12)).astype(xn_ref.dtype)

        # --- bias head: fc1 -> ReLU -> fc2 (lane reduce, no N=1 MXU matmul) ---
        h = jax.lax.dot_general(xb_ref[...], w1_ref[...], contract_last,
                                preferred_element_type=jnp.float32) + b1_ref[...]
        h = jnp.maximum(h, 0.0)                                  # [TB, 128]
        bias_out_ref[...] = (jnp.sum(h * w2_ref[...], axis=-1, keepdims=True)
                             + b2_ref[...])                      # [TB, 1]

    # --- cosine for this (batch, class) tile: bf16 x bf16, f32 accumulation ---
    cosine = jax.lax.dot_general(xn_ref[...], wn_ref[...], contract_last,
                                 preferred_element_type=jnp.float32)  # [TB, TC]

    labels = label_ref[...]                                      # [TB, 1] int32
    lo = j * tile_c
    in_tile = (labels >= lo) & (labels < lo + tile_c)
    has_label = jnp.max(in_tile.astype(jnp.int32)) > 0

    @pl.when(has_label)
    def _():
        # Margin epilogue only for class tiles that actually contain a label.
        sine = jnp.sqrt(jnp.maximum(1.0 - cosine * cosine, 0.0))
        phi = cosine * cos_m - sine * sin_m
        phi = jnp.where(cosine > th, phi, cosine - mm)           # easy_margin=False
        col = jax.lax.broadcasted_iota(jnp.int32, cosine.shape, 1)
        arc_out_ref[...] = s * jnp.where(col == labels - lo, phi, cosine)

    @pl.when(jnp.logical_not(has_label))
    def _():
        arc_out_ref[...] = s * cosine


# ----------------------------------------------------------------------------
# Tile selection under an explicit VMEM budget (double-buffered blocks)
# ----------------------------------------------------------------------------
def _vmem_bytes(tb, tc, arc_in, bias_in):
    return (2 * tb * arc_in * 4            # x_arc blocks (f32)
            + 2 * tb * max(bias_in, 1) * 4  # x_bias blocks
            + 2 * tc * arc_in * 2          # wn blocks (bf16)
            + 2 * tb * tc * 4              # arc_out blocks
            + 2 * tb * 128 * 4             # label blocks (lane-padded)
            + 2 * tb * 128 * 4             # bias_out blocks (lane-padded)
            + tb * arc_in * 2              # xn scratch (bf16)
            + tb * 128 * 4                 # fc1 activation
            + 2 * (128 * max(bias_in, 128) + 3 * 128) * 4)  # fc1/fc2 params


def _pick_tiles(B_pad, C_pad, arc_in, bias_in):
    # Class tile: lane-dense, capped at 1024, dividing C_pad (C_pad % 128 == 0).
    tc = min(1024, C_pad)
    while C_pad % tc:
        tc -= 128
    # Batch tile: largest multiple of 8 dividing B_pad that fits the budget.
    tb = min(1024, B_pad)
    tb -= tb % 8
    while tb > 8 and (B_pad % tb or
                      _vmem_bytes(tb, tc, arc_in, bias_in) > VMEM_BUDGET_BYTES):
        tb -= 8
    tb = max(tb, 8)
    # If even tb=8 does not fit, shrink the class tile.
    while tc > 128 and _vmem_bytes(tb, tc, arc_in, bias_in) > VMEM_BUDGET_BYTES:
        tc -= 128
        while C_pad % tc:
            tc -= 128
    # v7x megacore: keep >= 2 batch tiles so both TensorCores get work, as long
    # as the tile stays >= 256 (keeps the wn stream amortized on v5e/v6e too).
    if B_pad // tb < 2 and B_pad >= 512:
        half = tb - 8
        while half >= 256:
            if B_pad % half == 0:
                tb = half
                break
            half -= 8
    return tb, tc


# ----------------------------------------------------------------------------
# Wrapper
# ----------------------------------------------------------------------------
def bias_loss_forward(x, label, params, *, arcface_in_features, s=30.0, m=0.5):
    """x: [B, total_in] f32, label: [B] int.  Returns (x_bias [B,1], x_arcface [B,C])."""
    B, total_in = x.shape
    arc_in = arcface_in_features
    bias_in = total_in - arc_in

    w1, b1, w2, b2, arc_w = (params["fc1_w"], params["fc1_b"],
                             params["fc2_w"], params["fc2_b"],
                             params["arc_w"])
    C = arc_w.shape[0]

    B_pad = -(-B // 8) * 8
    C_pad = -(-C // 128) * 128

    # Split at the (possibly unaligned) feature boundary in the wrapper so the
    # kernel never slices mid-(8,128) lane tile; pad batch rows (labels -> -1).
    x_arc = x[:, :arc_in]
    x_bias = x[:, arc_in:]
    lbl = label.astype(jnp.int32).reshape(B, 1)
    if B_pad != B:
        x_arc = jnp.pad(x_arc, ((0, B_pad - B), (0, 0)))
        x_bias = jnp.pad(x_bias, ((0, B_pad - B), (0, 0)))
        lbl = jnp.pad(lbl, ((0, B_pad - B), (0, 0)), constant_values=-1)

    # L2-normalize ArcFace weight rows once (f32), pad classes, cast to bf16:
    # halves the dominant recurring HBM stream and runs the cosine matmul at
    # the MXU's native bf16 rate.  Accumulation stays f32 in the kernel.
    wn = arc_w / jnp.maximum(
        jnp.sqrt(jnp.sum(arc_w * arc_w, axis=-1, keepdims=True)), 1e-12)
    if C_pad != C:
        wn = jnp.pad(wn, ((0, C_pad - C), (0, 0)))
    wn = wn.astype(jnp.bfloat16)

    tile_b, tile_c = _pick_tiles(B_pad, C_pad, arc_in, bias_in)
    grid = (B_pad // tile_b, C_pad // tile_c)

    b1r = b1.reshape(1, -1)
    w2r = w2.reshape(1, -1)
    b2r = b2.reshape(1, 1)

    kernel = functools.partial(
        _bias_loss_kernel, tile_c=tile_c,
        cos_m=math.cos(m), sin_m=math.sin(m),
        th=math.cos(math.pi - m), mm=math.sin(math.pi - m) * m, s=s)

    bias_out, arc_out = pl.pallas_call(
        kernel,
        out_shape=(jax.ShapeDtypeStruct((B_pad, 1), jnp.float32),
                   jax.ShapeDtypeStruct((B_pad, C_pad), jnp.float32)),
        grid_spec=pltpu.PrefetchScalarGridSpec(
            num_scalar_prefetch=0,
            grid=grid,
            in_specs=[
                pl.BlockSpec((tile_b, arc_in), lambda i, j: (i, 0)),    # x_arc
                pl.BlockSpec((tile_b, bias_in), lambda i, j: (i, 0)),   # x_bias
                pl.BlockSpec((tile_c, arc_in), lambda i, j: (j, 0)),    # normalized W (bf16)
                pl.BlockSpec((tile_b, 1), lambda i, j: (i, 0)),         # labels
                pl.BlockSpec(w1.shape, lambda i, j: (0, 0)),            # fc1 W (resident)
                pl.BlockSpec(b1r.shape, lambda i, j: (0, 0)),           # fc1 b
                pl.BlockSpec(w2r.shape, lambda i, j: (0, 0)),           # fc2 W row
                pl.BlockSpec(b2r.shape, lambda i, j: (0, 0)),           # fc2 b
            ],
            out_specs=[
                pl.BlockSpec((tile_b, 1), lambda i, j: (i, 0)),         # bias head
                pl.BlockSpec((tile_b, tile_c), lambda i, j: (i, j)),    # arc logits
            ],
            scratch_shapes=[pltpu.VMEM((tile_b, arc_in), jnp.bfloat16)],  # cached xn
        ),
        compiler_params=pltpu.CompilerParams(
            dimension_semantics=("parallel", "arbitrary"),
            vmem_limit_bytes=VMEM_LIMIT_BYTES),
    )(x_arc, x_bias, wn, lbl, w1, b1r, w2r, b2r)

    return bias_out[:B], arc_out[:B, :C]


# ----------------------------------------------------------------------------
# Pure-JAX reference for validation
# ----------------------------------------------------------------------------
def _reference(x, label, params, *, arcface_in_features, s=30.0, m=0.5,
               match_bf16=False):
    x_arc = x[:, :arcface_in_features]
    x_bias = x[:, arcface_in_features:]
    h = jnp.maximum(x_bias @ params["fc1_w"].T + params["fc1_b"], 0.0)
    bias_out = h @ params["fc2_w"].T + params["fc2_b"]

    def norm(v):
        return v / jnp.maximum(jnp.linalg.norm(v, axis=-1, keepdims=True), 1e-12)

    xn, wn = norm(x_arc), norm(params["arc_w"])
    if match_bf16:
        xn, wn = xn.astype(jnp.bfloat16), wn.astype(jnp.bfloat16)
    cosine = jnp.dot(xn, wn.T, preferred_element_type=jnp.float32)
    sine = jnp.sqrt(jnp.clip(1.0 - cosine ** 2, 0.0, 1.0))
    phi = cosine * math.cos(m) - sine * math.sin(m)
    phi = jnp.where(cosine > math.cos(math.pi - m), phi,
                    cosine - math.sin(math.pi - m) * m)
    one_hot = jax.nn.one_hot(label, cosine.shape[1], dtype=cosine.dtype)
    arc_out = s * (one_hot * phi + (1.0 - one_hot) * cosine)
    return bias_out, arc_out


if __name__ == "__main__":
    B = 8
    total_in = 96
    arcface_in = 64
    bias_in = total_in - arcface_in   # 32
    out_features = 16

    key = jax.random.PRNGKey(0)
    k_x, k_lbl, k_w1, k_b1, k_w2, k_b2, k_arc = jax.random.split(key, 7)

    x = jax.random.normal(k_x, (B, total_in), dtype=jnp.float32)
    label = jax.random.randint(k_lbl, (B,), 0, out_features, dtype=jnp.int32)

    # Deterministic synthetic parameters (PyTorch-style shapes [out, in]).
    def xavier(k, shape):
        fan_out, fan_in = shape
        lim = math.sqrt(6.0 / (fan_in + fan_out))
        return jax.random.uniform(k, shape, jnp.float32, -lim, lim)

    params = {
        "fc1_w": xavier(k_w1, (128, bias_in)),
        "fc1_b": jax.random.uniform(k_b1, (128,), jnp.float32, -0.1, 0.1),
        "fc2_w": xavier(k_w2, (1, 128)),
        "fc2_b": jax.random.uniform(k_b2, (1,), jnp.float32, -0.1, 0.1),
        "arc_w": xavier(k_arc, (out_features, arcface_in)),
    }

    bias_out, arc_out = bias_loss_forward(
        x, label, params, arcface_in_features=arcface_in, s=30.0, m=0.5)
    jax.block_until_ready((bias_out, arc_out))

    assert bias_out.shape == (B, 1) and arc_out.shape == (B, out_features)

    # Algorithm-matched reference (bf16 cosine operands, f32 accumulation).
    ref_bias, ref_arc = _reference(
        x, label, params, arcface_in_features=arcface_in, s=30.0, m=0.5,
        match_bf16=True)
    assert jnp.allclose(bias_out, ref_bias, atol=1e-4, rtol=1e-4)
    assert jnp.allclose(arc_out, ref_arc, atol=1e-3, rtol=1e-3)

    # Full-f32 PyTorch-equivalent reference: only bf16 operand rounding remains.
    _, ref_arc_f32 = _reference(
        x, label, params, arcface_in_features=arcface_in, s=30.0, m=0.5,
        match_bf16=False)
    assert jnp.allclose(arc_out, ref_arc_f32, atol=0.25)

    print("KERNEL_OK")
</pallas_src>

<mosaic_0001>
module attributes {stable_mosaic.version = 11 : i64} {
  func.func @_bias_loss_kernel(%arg0: i32, %arg1: i32, %arg2: memref<8x64xf32, #tpu.memory_space<vmem>>, %arg3: memref<8x32xf32, #tpu.memory_space<vmem>>, %arg4: memref<128x64xbf16, #tpu.memory_space<vmem>>, %arg5: memref<8x1xi32, #tpu.memory_space<vmem>>, %arg6: memref<128x32xf32, #tpu.memory_space<vmem>>, %arg7: memref<1x128xf32, #tpu.memory_space<vmem>>, %arg8: memref<1x128xf32, #tpu.memory_space<vmem>>, %arg9: memref<1x1xf32, #tpu.memory_space<vmem>>, %arg10: memref<8x1xf32, #tpu.memory_space<vmem>>, %arg11: memref<8x128xf32, #tpu.memory_space<vmem>>, %arg12: memref<8x64xbf16, #tpu.memory_space<vmem>>) attributes {dimension_semantics = [#tpu.dimension_semantics<parallel>, #tpu.dimension_semantics<arbitrary>], iteration_bounds = array<i64: 1, 1>, scalar_prefetch = 0 : i64, scratch_operands = 1 : i64, tpu.core_type = #tpu.core_type<tc>, window_params = [{transform_indices = @transform_0, window_bounds = array<i64: 8, 64>}, {transform_indices = @transform_1, window_bounds = array<i64: 8, 32>}, {transform_indices = @transform_2, window_bounds = array<i64: 128, 64>}, {transform_indices = @transform_3, window_bounds = array<i64: 8, 1>}, {pipeline_mode = #tpu.pipeline_mode<synchronous>, transform_indices = @transform_4, window_bounds = array<i64: 128, 32>}, {pipeline_mode = #tpu.pipeline_mode<synchronous>, transform_indices = @transform_5, window_bounds = array<i64: 1, 128>}, {pipeline_mode = #tpu.pipeline_mode<synchronous>, transform_indices = @transform_6, window_bounds = array<i64: 1, 128>}, {pipeline_mode = #tpu.pipeline_mode<synchronous>, transform_indices = @transform_7, window_bounds = array<i64: 1, 1>}, {transform_indices = @transform_8, window_bounds = array<i64: 8, 1>}, {transform_indices = @transform_9, window_bounds = array<i64: 8, 128>}]} {
    %c0_i32 = arith.constant 0 : i32
    %0 = arith.cmpi eq, %arg1, %c0_i32 : i32
    %1 = arith.extui %0 : i1 to i32
    %c0_i32_0 = arith.constant 0 : i32
    %2 = arith.cmpi ne, %1, %c0_i32_0 : i32
    scf.if %2 {
      %c0_11 = arith.constant 0 : index
      %c0_12 = arith.constant 0 : index
      %25 = vector.load %arg2[%c0_11, %c0_12] : memref<8x64xf32, #tpu.memory_space<vmem>>, vector<8x64xf32>
      %26 = arith.mulf %25, %25 : vector<8x64xf32>
      %cst_13 = arith.constant dense<0.000000e+00> : vector<8xf32>
      %27 = vector.multi_reduction <add>, %26, %cst_13 [1] : vector<8x64xf32> to vector<8xf32>
      %28 = vector.shape_cast %27 : vector<8xf32> to vector<8x1xf32>
      %29 = math.sqrt %28 : vector<8x1xf32>
      %cst_14 = arith.constant 9.99999996E-13 : f32
      %30 = vector.broadcast %cst_14 : f32 to vector<8x1xf32>
      %31 = arith.maximumf %29, %30 : vector<8x1xf32>
      %32 = vector.broadcast %31 : vector<8x1xf32> to vector<8x64xf32>
      %33 = arith.divf %25, %32 : vector<8x64xf32>
      %34 = arith.truncf %33 : vector<8x64xf32> to vector<8x64xbf16>
      %c0_15 = arith.constant 0 : index
      %c0_16 = arith.constant 0 : index
      %35 = vector.load %arg12[%c0_15, %c0_16] : memref<8x64xbf16, #tpu.memory_space<vmem>>, vector<8x64xbf16>
      tpu.vector_store %arg12[%c0_15, %c0_16], %34 {strides = array<i32>} : memref<8x64xbf16, #tpu.memory_space<vmem>>, vector<8x64xbf16>,
      %c0_17 = arith.constant 0 : index
      %c0_18 = arith.constant 0 : index
      %36 = vector.load %arg3[%c0_17, %c0_18] : memref<8x32xf32, #tpu.memory_space<vmem>>, vector<8x32xf32>
      %c0_19 = arith.constant 0 : index
      %c0_20 = arith.constant 0 : index
      %37 = vector.load %arg6[%c0_19, %c0_20] : memref<128x32xf32, #tpu.memory_space<vmem>>, vector<128x32xf32>
      %cst_21 = arith.constant dense<0.000000e+00> : vector<8x128xf32>
      %38 = tpu.matmul %36, %37, %cst_21 {dimension_numbers = #tpu.dot_dimension_numbers<[1], [1], [0], [0], [0, 0, 1, 0], [], []>} : vector<8x32xf32>, vector<128x32xf32>, vector<8x128xf32> -> vector<8x128xf32>
      %c0_22 = arith.constant 0 : index
      %c0_23 = arith.constant 0 : index
      %39 = vector.load %arg7[%c0_22, %c0_23] : memref<1x128xf32, #tpu.memory_space<vmem>>, vector<1x128xf32>
      %40 = vector.broadcast %39 : vector<1x128xf32> to vector<8x128xf32>
      %41 = arith.addf %38, %40 : vector<8x128xf32>
      %cst_24 = arith.constant 0.000000e+00 : f32
      %42 = vector.broadcast %cst_24 : f32 to vector<8x128xf32>
      %43 = arith.maximumf %41, %42 : vector<8x128xf32>
      %c0_25 = arith.constant 0 : index
      %c0_26 = arith.constant 0 : index
      %44 = vector.load %arg8[%c0_25, %c0_26] : memref<1x128xf32, #tpu.memory_space<vmem>>, vector<1x128xf32>
      %45 = vector.broadcast %44 : vector<1x128xf32> to vector<8x128xf32>
      %46 = arith.mulf %43, %45 : vector<8x128xf32>
      %cst_27 = arith.constant dense<0.000000e+00> : vector<8xf32>
      %47 = vector.multi_reduction <add>, %46, %cst_27 [1] : vector<8x128xf32> to vector<8xf32>
      %48 = vector.shape_cast %47 : vector<8xf32> to vector<8x1xf32>
      %c0_28 = arith.constant 0 : index
      %c0_29 = arith.constant 0 : index
      %49 = vector.load %arg9[%c0_28, %c0_29] : memref<1x1xf32, #tpu.memory_space<vmem>>, vector<1x1xf32>
      %50 = vector.broadcast %49 : vector<1x1xf32> to vector<8x1xf32>
      %51 = arith.addf %48, %50 : vector<8x1xf32>
      %c0_30 = arith.constant 0 : index
      %c0_31 = arith.constant 0 : index
      %52 = vector.load %arg10[%c0_30, %c0_31] : memref<8x1xf32, #tpu.memory_space<vmem>>, vector<8x1xf32>
      tpu.vector_store %arg10[%c0_30, %c0_31], %51 {strides = array<i32>} : memref<8x1xf32, #tpu.memory_space<vmem>>, vector<8x1xf32>,
    } else {
    }
    %c0 = arith.constant 0 : index
    %c0_1 = arith.constant 0 : index
    %3 = vector.load %arg12[%c0, %c0_1] : memref<8x64xbf16, #tpu.memory_space<vmem>>, vector<8x64xbf16>
    %c0_2 = arith.constant 0 : index
    %c0_3 = arith.constant 0 : index
    %4 = vector.load %arg4[%c0_2, %c0_3] : memref<128x64xbf16, #tpu.memory_space<vmem>>, vector<128x64xbf16>
    %cst = arith.constant dense<0.000000e+00> : vector<8x128xf32>
    %5 = tpu.matmul %3, %4, %cst {dimension_numbers = #tpu.dot_dimension_numbers<[1], [1], [0], [0], [0, 0, 1, 0], [], []>} : vector<8x64xbf16>, vector<128x64xbf16>, vector<8x128xf32> -> vector<8x128xf32>
    %c0_4 = arith.constant 0 : index
    %c0_5 = arith.constant 0 : index
    %6 = vector.load %arg5[%c0_4, %c0_5] : memref<8x1xi32, #tpu.memory_space<vmem>>, vector<8x1xi32>
    %c128_i32 = arith.constant 128 : i32
    %7 = arith.muli %arg1, %c128_i32 : i32
    %8 = vector.broadcast %7 : i32 to vector<8x1xi32>
    %9 = arith.cmpi sge, %6, %8 : vector<8x1xi32>
    %c128_i32_6 = arith.constant 128 : i32
    %10 = arith.addi %7, %c128_i32_6 : i32
    %11 = vector.broadcast %10 : i32 to vector<8x1xi32>
    %12 = arith.cmpi slt, %6, %11 : vector<8x1xi32>
    %13 = arith.andi %9, %12 : vector<8x1xi1>
    %14 = arith.extui %13 : vector<8x1xi1> to vector<8x1xi32>
    %15 = vector.shape_cast %14 : vector<8x1xi32> to vector<1x8x1xi32>
    %cst_7 = arith.constant dense<-2147483648> : vector<1xi32>
    %16 = vector.multi_reduction <maxsi>, %15, %cst_7 [1, 2] : vector<1x8x1xi32> to vector<1xi32>
    %17 = vector.shape_cast %16 : vector<1xi32> to vector<1x1x1xi32>
    %18 = vector.extract %17[0, 0, 0] : i32 from vector<1x1x1xi32>
    %c0_i32_8 = arith.constant 0 : i32
    %19 = arith.cmpi sgt, %18, %c0_i32_8 : i32
    %20 = arith.extui %19 : i1 to i32
    %c0_i32_9 = arith.constant 0 : i32
    %21 = arith.cmpi ne, %20, %c0_i32_9 : i32
    scf.if %21 {
      %25 = arith.mulf %5, %5 : vector<8x128xf32>
      %cst_11 = arith.constant 1.000000e+00 : f32
      %26 = vector.broadcast %cst_11 : f32 to vector<8x128xf32>
      %27 = arith.subf %26, %25 : vector<8x128xf32>
      %cst_12 = arith.constant 0.000000e+00 : f32
      %28 = vector.broadcast %cst_12 : f32 to vector<8x128xf32>
      %29 = arith.maximumf %27, %28 : vector<8x128xf32>
      %30 = math.sqrt %29 : vector<8x128xf32>
      %cst_13 = arith.constant 0.87758255 : f32
      %31 = vector.broadcast %cst_13 : f32 to vector<8x128xf32>
      %32 = arith.mulf %5, %31 : vector<8x128xf32>
      %cst_14 = arith.constant 0.47942555 : f32
      %33 = vector.broadcast %cst_14 : f32 to vector<8x128xf32>
      %34 = arith.mulf %30, %33 : vector<8x128xf32>
      %35 = arith.subf %32, %34 : vector<8x128xf32>
      %cst_15 = arith.constant -0.87758255 : f32
      %36 = vector.broadcast %cst_15 : f32 to vector<8x128xf32>
      %37 = arith.cmpf ogt, %5, %36 : vector<8x128xf32>
      %cst_16 = arith.constant 0.239712775 : f32
      %38 = vector.broadcast %cst_16 : f32 to vector<8x128xf32>
      %39 = arith.subf %5, %38 : vector<8x128xf32>
      %40 = arith.select %37, %35, %39 : vector<8x128xi1>, vector<8x128xf32>
      %41 = tpu.iota {dimensions = array<i32: 1>} : vector<8x128xi32>
      %42 = vector.broadcast %7 : i32 to vector<8x1xi32>
      %43 = arith.subi %6, %42 : vector<8x1xi32>
      %44 = vector.broadcast %43 : vector<8x1xi32> to vector<8x128xi32>
      %45 = arith.cmpi eq, %41, %44 : vector<8x128xi32>
      %46 = arith.select %45, %40, %5 : vector<8x128xi1>, vector<8x128xf32>
      %cst_17 = arith.constant 3.000000e+01 : f32
      %47 = vector.broadcast %cst_17 : f32 to vector<8x128xf32>
      %48 = arith.mulf %47, %46 : vector<8x128xf32>
      %c0_18 = arith.constant 0 : index
      %c0_19 = arith.constant 0 : index
      %49 = vector.load %arg11[%c0_18, %c0_19] : memref<8x128xf32, #tpu.memory_space<vmem>>, vector<8x128xf32>
      tpu.vector_store %arg11[%c0_18, %c0_19], %48 {strides = array<i32>} : memref<8x128xf32, #tpu.memory_space<vmem>>, vector<8x128xf32>,
    } else {
    }
    %true = arith.constant true
    %22 = arith.xori %19, %true : i1
    %23 = arith.extui %22 : i1 to i32
    %c0_i32_10 = arith.constant 0 : i32
    %24 = arith.cmpi ne, %23, %c0_i32_10 : i32
    scf.if %24 {
      %cst_11 = arith.constant 3.000000e+01 : f32
      %25 = vector.broadcast %cst_11 : f32 to vector<8x128xf32>
      %26 = arith.mulf %25, %5 : vector<8x128xf32>
      %c0_12 = arith.constant 0 : index
      %c0_13 = arith.constant 0 : index
      %27 = vector.load %arg11[%c0_12, %c0_13] : memref<8x128xf32, #tpu.memory_space<vmem>>, vector<8x128xf32>
      tpu.vector_store %arg11[%c0_12, %c0_13], %26 {strides = array<i32>} : memref<8x128xf32, #tpu.memory_space<vmem>>, vector<8x128xf32>,
    } else {
    }
    return
  }
  func.func @transform_0(%arg0: i32, %arg1: i32) -> (i32, i32) {
    %c0_i32 = arith.constant 0 : i32
    %c0_i32_0 = arith.constant 0 : i32
    return %arg0, %c0_i32 : i32, i32
  }
  func.func @transform_1(%arg0: i32, %arg1: i32) -> (i32, i32) {
    %c0_i32 = arith.constant 0 : i32
    %c0_i32_0 = arith.constant 0 : i32
    return %arg0, %c0_i32 : i32, i32
  }
  func.func @transform_2(%arg0: i32, %arg1: i32) -> (i32, i32) {
    %c0_i32 = arith.constant 0 : i32
    %c0_i32_0 = arith.constant 0 : i32
    return %arg1, %c0_i32 : i32, i32
  }
  func.func @transform_3(%arg0: i32, %arg1: i32) -> (i32, i32) {
    %c0_i32 = arith.constant 0 : i32
    %c0_i32_0 = arith.constant 0 : i32
    return %arg0, %c0_i32 : i32, i32
  }
  func.func @transform_4(%arg0: i32, %arg1: i32) -> (i32, i32) {
    %c0_i32 = arith.constant 0 : i32
    %c0_i32_0 = arith.constant 0 : i32
    %c0_i32_1 = arith.constant 0 : i32
    return %c0_i32, %c0_i32_0 : i32, i32
  }
  func.func @transform_5(%arg0: i32, %arg1: i32) -> (i32, i32) {
    %c0_i32 = arith.constant 0 : i32
    %c0_i32_0 = arith.constant 0 : i32
    %c0_i32_1 = arith.constant 0 : i32
    return %c0_i32, %c0_i32_0 : i32, i32
  }
  func.func @transform_6(%arg0: i32, %arg1: i32) -> (i32, i32) {
    %c0_i32 = arith.constant 0 : i32
    %c0_i32_0 = arith.constant 0 : i32
    %c0_i32_1 = arith.constant 0 : i32
    return %c0_i32, %c0_i32_0 : i32, i32
  }
  func.func @transform_7(%arg0: i32, %arg1: i32) -> (i32, i32) {
    %c0_i32 = arith.constant 0 : i32
    %c0_i32_0 = arith.constant 0 : i32
    %c0_i32_1 = arith.constant 0 : i32
    return %c0_i32, %c0_i32_0 : i32, i32
  }
  func.func @transform_8(%arg0: i32, %arg1: i32) -> (i32, i32) {
    %c0_i32 = arith.constant 0 : i32
    %c0_i32_0 = arith.constant 0 : i32
    return %arg0, %c0_i32 : i32, i32
  }
  func.func @transform_9(%arg0: i32, %arg1: i32) -> (i32, i32) {
    %c0_i32 = arith.constant 0 : i32
    return %arg0, %arg1 : i32, i32
  }
}

</mosaic_0001>

<bundles_post_ra>
// kernel: tpu_custom_call.1
= control target key start
LH: loop header
LB: loop body
LE: loop exit
PB: predicated region body
PF: predicated region fallthrough
CT: control target
= control target key end

     0   :  { %s867_s0 = inlined_call_operand.vmem [shape: f32[8,64], index: 0, kind: input, shape index: {}]   ;;  %s868_s1 = inlined_call_operand.vmem [shape: f32[8,32], index: 1, kind: input, shape index: {}]   ;;  %s869_s2 = inlined_call_operand.vmem [shape: bf16[128,64], index: 2, kind: input, shape index: {}]   ;;  %s870_s3 = inlined_call_operand.vmem [shape: s32[8,1], index: 3, kind: input, shape index: {}]   ;;  %s871_s4 = inlined_call_operand.vmem [shape: f32[128,32], index: 4, kind: input, shape index: {}]   ;;  %s872_s5 = inlined_call_operand.vmem [shape: f32[1,128], index: 5, kind: input, shape index: {}]   ;;  %s873_s6 = inlined_call_operand.vmem [shape: f32[1,128], index: 6, kind: input, shape index: {}]   ;;  %s874_s7 = inlined_call_operand.<no memory space> [shape: f32[1,1], index: 7, kind: input, shape index: {}]   ;;  %s875_s8 = inlined_call_operand.vmem [shape: f32[8,1], index: 8, kind: output, shape index: {0}]   ;;  %s876_s9 = inlined_call_operand.hbm [shape: f32[8,128], index: 9, kind: output, shape index: {1}]  }
   0x1   :  { %v15_v0 = vstv %s874_s7 }
   0x2   :  { %16 = vst [vmem:[#allocation3] sm:$0x1] %v15_v0 }
   0x3   :  { %17 = vsyncpa [#allocation5], 0  ;;  %v59_v1 = vld [vmem:[%s871_s4] sm:$0xff]  ;;  %v60_v2 = vld [vmem:[%s871_s4 + $0x8] sm:$0xff]  ;;  %vm82_vm0 = vcmask 261120   ;;  %v631_v3 = vmov 0.0|0.0  }
   0x4   :  { %552 = vmatprep.subr.bf16.mxu0 %v631_v3  ;;  %v553_v4 = vpack.c.bf16 %v60_v2, %v59_v1  ;;  %vm699_vm1 = vmpackc.low %vm82_vm0, %vm82_vm0  ;;  %v706_v6 = vld [vmem:[%s867_s0] sm:$0xff]  ;;  %vm41_vm2 = vcmask 523264   ;;  %vm223_vm3 = vcmask 7168   ;;  %v632_v10 = vmov 0   ;;  %v61_v12 = vld [vmem:[%s871_s4 + $0x10] sm:$0xff] }
   0x5   :  { %v711_v7 = vld [vmem:[%s870_s3] sm:$0xff]  ;;  %v40_v8 = vmul.f32 %v706_v6, %v706_v6  ;;  %v62_v13 = vld [vmem:[%s871_s4 + $0x18] sm:$0xff]  ;;  %vm633_vm7 = vmmov 0   ;;  %v634_v14 = vmov 0.0   ;;  %v64_v21 = vld [vmem:[%s871_s4 + $0x28] sm:$0xff]  ;;  %vm56_vm11 = vcmask 519168  }
   0x6   :  { %vm353_vm4 = vcmp.ge.s32.totalorder %v711_v7, 0  ;;  %vm356_vm5 = vcmp.lt.s32.totalorder %v711_v7, 128  ;;  %555 = vmatpush3.bf16.xpose.msk.msra.mxu0 %vm699_vm1, %v553_v4  ;;  %529 = vmatprep.mubr.msk.f32.mxu0 %vm633_vm7, %v634_v14  ;;  %v557_v17 = vpack.c.bf16 %v62_v13, %v61_v12  ;;  %v592_v19 = vld [vmem:[%s869_s2] sm:$0xff]   ;;  %v593_v23 = vld [vmem:[%s869_s2 + $0x8] sm:$0xff]   ;;  %v65_v26 = vld [vmem:[%s871_s4 + $0x30] sm:$0xff] }
   0x7   :  { %vm357_vm6 = vmand %vm353_vm4, %vm356_vm5  ;;  %v42_v9 = vsel %vm41_vm2, %v40_v8, 0.0  ;;  %556 = vmatprep.subr.bf16.mxu0 %v631_v3  ;;  %532 = vmatprep.subr.bf16.mxu1 %v634_v14  ;;  %v63_v20 = vld [vmem:[%s871_s4 + $0x20] sm:$0xff]  ;;  %v287_v22 = vsel %vm41_vm2, %v592_v19, 0  ;;  %v290_v25 = vsel %vm41_vm2, %v593_v23, 0  ;;  %v66_v27 = vld [vmem:[%s871_s4 + $0x38] sm:$0xff] }
   0x8   :  { %v358_v11 = vsel %vm357_vm6, 1, %v632_v10  ;;  %43 = vadd.xlane.f32.xlu0 %v42_v9  ;;  %548 = vmatprep.mubr.msk.bf16.mxu1 %vm633_vm7, %v634_v14  ;;  %v561_v24 = vpack.c.bf16 %v64_v21, %v63_v20  ;;  %v594_v28 = vld [vmem:[%s869_s2 + $0x10] sm:$0xff]   ;;  %v565_v29 = vpack.c.bf16 %v66_v27, %v65_v26  ;;  %v67_v31 = vld [vmem:[%s871_s4 + $0x40] sm:$0xff]  ;;  %v68_v32 = vld [vmem:[%s871_s4 + $0x48] sm:$0xff] }
   0x9   :  { %v729_v15 = vsel %vm223_vm3, %v358_v11, 2147483648  ;;  %533 = vmatpush3.bf16.xpose.msra.mxu1 %v287_v22  ;;  %v293_v30 = vsel %vm41_vm2, %v594_v28, 0  ;;  %v595_v33 = vld [vmem:[%s869_s2 + $0x18] sm:$0xff]   ;;  %v569_v34 = vpack.c.bf16 %v68_v32, %v67_v31  ;;  %v69_v36 = vld [vmem:[%s871_s4 + $0x50] sm:$0xff]  ;;  %v596_v38 = vld [vmem:[%s869_s2 + $0x20] sm:$0xff]  }
   0xa   :  { %v362_v16 = vshra.s32 %v729_v15, 16  ;;  %534 = vmatprep.subr.bf16.mxu1 %v634_v14  ;;  %v296_v35 = vsel %vm41_vm2, %v595_v33, 0  ;;  %v70_v37 = vld [vmem:[%s871_s4 + $0x58] sm:$0xff]  ;;  %v299_v40 = vsel %vm41_vm2, %v596_v38, 0  ;;  %v71_v41 = vld [vmem:[%s871_s4 + $0x60] sm:$0xff]  ;;  %v72_v42 = vld [vmem:[%s871_s4 + $0x68] sm:$0xff] }
   0xb   :  { %v573_v39 = vpack.c.bf16 %v70_v37, %v69_v36  ;;  %v597_v43 = vld [vmem:[%s869_s2 + $0x28] sm:$0xff]   ;;  %v577_v44 = vpack.c.bf16 %v72_v42, %v71_v41  ;;  %v73_v46 = vld [vmem:[%s871_s4 + $0x70] sm:$0xff]  ;;  %v74_v47 = vld [vmem:[%s871_s4 + $0x78] sm:$0xff]  ;;  %v361_v54 = vand.u32 65535, %v729_v15 }
   0xc   :  { %v734_v18 = vcvt.s32.f32 %v362_v16  ;;  %v302_v45 = vsel %vm41_vm2, %v597_v43, 0  ;;  %v598_v48 = vld [vmem:[%s869_s2 + $0x30] sm:$0xff]   ;;  %v581_v49 = vpack.c.bf16 %v74_v47, %v73_v46  ;;  %v599_v51 = vld [vmem:[%s869_s2 + $0x38] sm:$0xff]   ;;  %v58_v52 = vld [vmem:[%s868_s1] sm:$0xff] }
   0xd   :  { %v305_v50 = vsel %vm41_vm2, %v598_v48, 0  ;;  %v308_v53 = vsel %vm41_vm2, %v599_v51, 0  ;;  %v363_v56 = vcvt.s32.f32 %v361_v54  ;;  %v439_v5 = vld [vmem:[%s872_s5] ss:$0 sm:$0xff]  ;;  %v458_v28 = vld [vmem:[#allocation3] ss:$0 sm:$0xff] }
   0xe   :  { %365 = vmax.xlane.f32.xlu0 %v734_v18  ;;  %559 = vmatpush3.bf16.xpose.msk.msra.mxu0 %vm699_vm1, %v557_v17  ;;  %v457_v11 = vld [vmem:[%s873_s6] ss:$0 sm:$0xff] }
   0xf   :  { %560 = vmatprep.subr.bf16.mxu0 %v631_v3 }
  0x11   :  { %535 = vmatpush3.bf16.xpose.msra.mxu1 %v290_v25 }
  0x12   :  { %536 = vmatprep.subr.bf16.mxu1 %v634_v14 }
  0x16   :  { %563 = vmatpush3.bf16.xpose.msk.msra.mxu0 %vm699_vm1, %v561_v24 }
  0x17   :  { %564 = vmatprep.subr.bf16.mxu0 %v631_v3 }
  0x19   :  { %537 = vmatpush3.bf16.xpose.msra.mxu1 %v293_v30 }
  0x1a   :  { %538 = vmatprep.subr.bf16.mxu1 %v634_v14 }
  0x1e   :  { %567 = vmatpush3.bf16.xpose.msk.msra.mxu0 %vm699_vm1, %v565_v29 }
  0x1f   :  { %568 = vmatprep.subr.bf16.mxu0 %v631_v3 }
  0x21   :  { %539 = vmatpush3.bf16.xpose.msra.mxu1 %v296_v35 }
  0x22   :  { %540 = vmatprep.subr.bf16.mxu1 %v634_v14 }
  0x26   :  { %571 = vmatpush3.bf16.xpose.msk.msra.mxu0 %vm699_vm1, %v569_v34 }
  0x27   :  { %572 = vmatprep.subr.bf16.mxu0 %v631_v3 }
  0x29   :  { %541 = vmatpush3.bf16.xpose.msra.mxu1 %v299_v40 }
  0x2a   :  { %542 = vmatprep.subr.bf16.mxu1 %v634_v14 }
  0x2e   :  { %575 = vmatpush3.bf16.xpose.msk.msra.mxu0 %vm699_vm1, %v573_v39 }
  0x2f   :  { %576 = vmatprep.subr.bf16.mxu0 %v631_v3 }
  0x31   :  { %543 = vmatpush3.bf16.xpose.msra.mxu1 %v302_v45 }
  0x32   :  { %544 = vmatprep.subr.bf16.mxu1 %v634_v14 }
  0x36   :  { %579 = vmatpush3.bf16.xpose.msk.msra.mxu0 %vm699_vm1, %v577_v44 }
  0x37   :  { %580 = vmatprep.subr.bf16.mxu0 %v631_v3 }
  0x39   :  { %545 = vmatpush3.bf16.xpose.msra.mxu1 %v305_v50 }
  0x3a   :  { %546 = vmatprep.subr.bf16.mxu1 %v634_v14 }
  0x3e   :  { %583 = vmatpush3.bf16.xpose.msk.msra.mxu0 %vm699_vm1, %v581_v49 }
  0x41   :  { %547 = vmatpush3.bf16.xpose.msra.mxu1 %v308_v53 }
  0x45   :  { %530 = vmatmul.mubr.msk.f32.vlgmr.msra.gmra.mrb[0].mxu0 %vm82_vm0, %v58_v52 }
  0x95   :  { %v44_v55 = vpop.xlane.xlu0 %43 }
  0x96   :  { %600 = vrsqrt.f32 %v44_v55  ;;  %vm47_vm9 = vcmp.eq.f32.partialorder %v44_v55, inf  ;;  %v50_v60 = vand.u32 2147483648, %v44_v55  ;;  %vm49_vm10 = vcmp.eq.f32.partialorder %v44_v55, 0.0 }
  0x9b   :  { %v366_v57 = vpop.xlane.xlu0 %365 }
  0x9c   :  { %vm367_vm8 = vcmp.eq.f32.partialorder %v734_v18, %v366_v57 }
  0x9d   :  { %v368_v58 = vsel %vm367_vm8, %v363_v56, -inf }
  0x9e   :  { %369 = vmax.xlane.f32.xlu1 %v368_v58 }
  0xa0   :  { %v601_v59 = vpop.eup %600 }
  0xa1   :  { %v46_v61 = vmul.f32 %v601_v59, %v44_v55 }
  0xa3   :  { %v48_v62 = vsel %vm47_vm9, %v44_v55, %v46_v61 }
  0xa4   :  { %v51_v63 = vsel %vm49_vm10, %v50_v60, %v48_v62 }
  0xa5   :  { %v52_v0 = vmax.f32 %v51_v63, 1e-12 }
  0xa7   :  { %602 = vrcp.f32 %v52_v0 }
  0xb1   :  { %v603_v1 = vpop.eup %602 }
  0xb2   :  { %v54_v2 = vmul.f32 %v603_v1, %v706_v6  ;;  %v372_v6 = vcvt.f32.s32 %v366_v57 }
  0xb4   :  { %v55_v3 = vpack.c.bf16 %v54_v2, %v54_v2  ;;  %v373_v15 = vshll.u32 %v372_v6, 16 }
  0xb6   :  { %57 = vst.msk [vmem:[#allocation2] sm:$0xf] %vm56_vm11, %v55_v3 }
  0xbd   :  { %v225_v4 = vld [vmem:[#allocation2] sm:$0xf] }
  0xbe   :  { %549 = vmatmul.mubr.msk.bf16.vlgmr.msra.gmra.mrb[0].mxu1 %vm41_vm2, %v225_v4 }
 0x118   :  { %v200_v8 = vpop.f32.mrb[0].mxu0 }
 0x119   :  { %v201_v9 = vadd.f32 %v439_v5, %v200_v8  ;;  %v531_v10 = vpop.f32.mrb[1].mxu0 }
 0x11b   :  { %v204_v12 = vmax.f32 %v201_v9, 0.0 }
 0x11d   :  { %v212_v13 = vmul.f32 %v457_v11, %v204_v12 }
 0x11f   :  { %213 = vadd.xlane.f32.xlu1 %v212_v13 }
 0x12b   :  { %v370_v14 = vpop.xlane.xlu1 %369 }
 0x12c   :  { %v371_v16 = vcvt.f32.s32 %v370_v14 }
 0x12e   :  { %v374_v17 = vadd.s32 %v373_v15, %v371_v16 }
 0x130   :  { %v375_v18 = vrot.slane %v374_v17, 4 }
 0x132   :  { %vm376_vm12 = vcmp.gt.s32.totalorder %v374_v17, %v375_v18 }
 0x133   :  { %v377_v19 = vsel %vm376_vm12, %v374_v17, %v375_v18 }
 0x134   :  { %v378_v20 = vrot.slane %v377_v19, 2 }
 0x136   :  { %vm379_vm13 = vcmp.gt.s32.totalorder %v377_v19, %v378_v20 }
 0x137   :  { %v380_v21 = vsel %vm379_vm13, %v377_v19, %v378_v20 }
 0x138   :  { %v381_v22 = vrot.slane %v380_v21, 1 }
 0x13a   :  { %vm382_vm14 = vcmp.gt.s32.totalorder %v380_v21, %v381_v22 }
 0x13b   :  { %v383_v23 = vsel %vm382_vm14, %v380_v21, %v381_v22 }
 0x13c   :  { %584 = vpush %v383_v23 }
 0x16d   :  { %s846_s5 = spop %584 }
 0x16e   :  { %p468_p0 = scmp.le.s32.totalorder %s846_s5, 0 }
 0x16f   :  { %v635_v31 = vmov (!%p468_p0), 0   ;;  %v405_v42 = vlaneseq (!%p468_p0) }
 0x170   :  { %604 = vset.pattern.permute.xlu0 (!%p468_p0), %v635_v31 }
 0x171   :  { %409 = vperm.xlu0 (!%p468_p0), %604, %v711_v7   ;;  %v406_v45 = vand.u32 (!%p468_p0), 127, %v405_v42 }
 0x191   :  { %v344_v24 = vpop.f32.mrb[0].mxu1 }
 0x192   :  { %v550_v25 = vpop.f32.mrb[1].mxu1  ;;  %v389_v32 = vmul.f32 (!%p468_p0), %v344_v24, %v344_v24  ;;  %v399_v40 = vmul.f32 (!%p468_p0), 0.87758255, %v344_v24  ;;  %v469_v44 = vadd.f32 (!%p468_p0), -0.23971277, %v344_v24 }
 0x193   :  { %v347_v26 = vpop.f32.mrb[2].mxu1  ;;  %vm402_vm1 = vcmp.gt.f32.partialorder (!%p468_p0), %v344_v24, -0.87758255 }
 0x194   :  { %v551_v27 = vpop.f32.mrb[3].mxu1  ;;  %v390_v33 = vsub.f32 (!%p468_p0), 1.0, %v389_v32 }
 0x196   :  { %v391_v34 = vmax.f32 (!%p468_p0), %v390_v33, 0.0 }
 0x198   :  { %605 = vrsqrt.f32 (!%p468_p0), %v391_v34  ;;  %vm394_vm15 = vcmp.eq.f32.partialorder (!%p468_p0), %v391_v34, inf  ;;  %v397_v37 = vand.u32 (!%p468_p0), 2147483648, %v391_v34  ;;  %vm396_vm0 = vcmp.eq.f32.partialorder (!%p468_p0), %v391_v34, 0.0 }
 0x1a2   :  { %v606_v35 = vpop.eup (!%p468_p0), %605 }
 0x1a3   :  { %v393_v36 = vmul.f32 (!%p468_p0), %v606_v35, %v391_v34 }
 0x1a5   :  { %v395_v38 = vsel (!%p468_p0), %vm394_vm15, %v391_v34, %v393_v36 }
 0x1a6   :  { %v398_v39 = vsel (!%p468_p0), %vm396_vm0, %v397_v37, %v395_v38 }
 0x1a7   :  { %v400_v41 = vmul.f32 (!%p468_p0), 0.47942555, %v398_v39 }
 0x1a9   :  { %388 = sbr.rel (%p468_p0) target bundleno = 502 (0x1f6), region = 41  ;;  %v401_v43 = vsub.f32 (!%p468_p0), %v399_v40, %v400_v41 }
 0x1ab   :  { %v404_v46 = vsel (!%p468_p0), %vm402_vm1, %v401_v43, %v469_v44 }
 0x1ac   :  { %v214_v29 = vpop.xlane.xlu1 %213 }
 0x1ad   :  { %v222_v30 = vadd.f32 %v458_v28, %v214_v29 }
 0x1af   :  { %224 = vst.msk [vmem:[%s875_s8] sm:$0xff] %vm223_vm3, %v222_v30 }
 0x1f0   :  { %v410_v7 = vpop.permute.xlu0 %409 }
 0x1f1   :  { %vm411_vm2 = vcmp.eq.s32.totalorder %v406_v45, %v410_v7 }
 0x1f2   :  { %v412_v47 = vsel %vm411_vm2, %v404_v46, %v344_v24 }
 0x1f3   :  { %v413_v48 = vmul.f32 30.0, %v412_v47 }
 0x1f5   :  { %414 = vst [vmem:[#allocation4] sm:$0xff] %v413_v48 }
 0x1f6 PF:  { %p470_p1 = scmp.gt.s32.totalorder %s846_s5, 0 }
 0x1f7   :  { %v419_v49 = vmul.f32 (!%p470_p1), 30.0, %v344_v24 }
 0x1f8   :  { %418 = sbr.rel (%p470_p1) target bundleno = 511 (0x1ff), region = 45 }
 0x1f9   :  { %420 = vst [vmem:[#allocation4] sm:$0xff] (!%p470_p1), %v419_v49 }
 0x1ff PF:  { %s636_s8 = smov [#allocation4]  }
 0x200   :  { %s429_s0 = sshll.u32 %s636_s8, 4  ;;  %s430_s0 = int_to_ptr.vmem [resolvable:$true] %s429_s0 }
 0x201   :  { %s607_s3 = scalar_lea.vmem %s430_s0, 128  ;;  %p612_p3 = scmp.lt.s32.totalorder %s430_s0, %s430_s0 }
 0x202   :  { %p608_p2 = scmp.ne.s32.totalorder %s430_s0, %s607_s3  ;;  %p613_p4 = scmp.lt.s32.totalorder %s607_s3, %s607_s3 }
 0x204   :  { %p614_p5 = por %p613_p4, %p612_p3 }
 0x206   :  { %p615_p6 = pnand %p614_p5, %p608_p2 }
 0x208   :  { %618 = shalt.err (!%p615_p6)
}
 0x209   :  { %s619_s20 = scalar_lea.hbm %s876_s9, 128 }
 0x20a   :  { %p620_p7 = scmp.ne.s32.totalorder %s876_s9, %s619_s20  ;;  %p623_p8 = scmp.lt.u32.totalorder %s619_s20, %s876_s9 }
 0x20c   :  { %p625_p9 = pnand %p623_p8, %p620_p7 }
 0x20e   :  { %628 = shalt.err (!%p625_p9)
}
 0x20f   :  { %432 = dma.vmem_to_hbm [thread:$0]  %s430_s0, 128, %s876_s9, [#allocation5]  }
 0x210   :  { %629 = dma.done.wait [#allocation5], 128  }
 0x211   :  { %630 = vsyncadd [#allocation5], 4294967168 }
 0x212   :  { %438 = vsyncpa [#allocation5], 1 }

</bundles_post_ra>
